<compile_context>
chip_gen: v6e
topology: v6e:2x2x1
jax: 0.10.0
libtpu: 0.0.40
codegen_flags: <defaults>
</compile_context>

<pallas_src>
import functools

import jax
import jax.numpy as jnp
import numpy as np
from jax import lax
from jax.experimental import pallas as pl
from jax.experimental.pallas import tpu as pltpu

SMOOTH = 1e-8
LANES = 128


def _round_up(x, m):
    return ((x + m - 1) // m) * m


def _dice_kernel(pred_ref, label_ref, oi_ref, os_ref, *, C, TR, L, RO):
    # pred_ref: (1, C, TR, L)   label_ref: (1, 1, TR, L)
    # oi_ref/os_ref: (1, 1, 8, L) per-(n, r) partial-sum tiles.
    n_chunks = TR // RO

    def chunk_body(ci, carry):
        acc_i, acc_s = carry
        row0 = pl.multiple_of(ci * RO, RO)        # sublane-aligned dynamic start
        rsl = pl.ds(row0, RO)

        # Running argmax over the channel axis in pred's native dtype
        # (bf16 compares stay bf16 on v6e/v7x; f32 elsewhere).  Strict '>'
        # keeps the FIRST index attaining the max, matching torch.argmax.
        best = pred_ref[0, 0, rsl, :]
        arg = jnp.zeros((RO, L), jnp.float32)
        for c in range(1, C):
            xc = pred_ref[0, c, rsl, :]
            upd = xc > best
            best = jnp.where(upd, xc, best)
            arg = jnp.where(upd, jnp.float32(c), arg)

        m1 = arg                                           # (RO, L) f32
        m2 = label_ref[0, 0, rsl, :].astype(jnp.float32)   # (RO, L) f32

        # Register-carried accumulation; chunks cover disjoint pixels but only
        # the global sum is needed, so elementwise folding is exact.
        return acc_i + m1 * m2, acc_s + (m1 + m2)

    init = (jnp.zeros((RO, L), jnp.float32), jnp.zeros((RO, L), jnp.float32))
    acc_i, acc_s = lax.fori_loop(0, n_chunks, chunk_body, init)

    # Fold the RO-row register accumulator to a single dense (8, L) tile:
    # pure per-vreg VPU adds (static sublane-aligned slices), no XLU.
    def fold8(a):
        out = a[0:8]
        for k in range(8, RO, 8):
            out = out + a[k:k + 8]
        return out

    # Exactly one unmasked, lane-dense store per output per grid step.
    oi_ref[0, 0, :, :] = fold8(acc_i)
    os_ref[0, 0, :, :] = fold8(acc_s)


@jax.jit
def dice_loss(pred, label):
    """pred: [N, C, H, W] float logits; label: [N, H, W] integer class map."""
    N, C, H, W = pred.shape
    HW = H * W
    L = LANES
    isz = jnp.dtype(pred.dtype).itemsize

    # Row-tile (second-to-minor dim) per grid step:
    #   * target ~1 MiB of pred per step (amortize per-step pipeline overhead)
    #   * cap so double-buffered (pred + label) stays <= ~8 MiB of VMEM,
    #     which fits the default scoped limit on every chip for any C.
    target_bytes = 1 << 20
    vmem_cap = 8 << 20
    tr_bytes = max(8, (target_bytes // (L * C * isz)) // 8 * 8)
    tr_vmax = max(8, (vmem_cap // (2 * L * (C * isz + 4))) // 8 * 8)
    r_needed = -(-HW // L)                       # rows of L pixels needed
    tr_cap = min(tr_bytes, tr_vmax, _round_up(r_needed, 8))

    # Prefer a row-tile that exactly divides the row count: avoids the padding
    # copy entirely when H*W is already lane-aligned (the common case).
    TR = tr_cap
    if HW % L == 0:
        for tr in range(tr_cap, max(8, tr_cap // 2) - 1, -8):
            if r_needed % tr == 0:
                TR = tr
                break

    grid_r = -(-r_needed // TR)
    hw_pad = grid_r * TR * L

    # Free reshapes (pixel axis becomes the lane-dense minor axes).
    pred2 = pred.reshape(N, C, HW)               # native dtype, no wrapper cast
    label2 = label.reshape(N, 1, HW)
    if hw_pad != HW:
        # Zero padding is exact: an all-zero padded pixel has argmax == 0 and
        # label == 0, so it contributes nothing to either sum.
        pred2 = jnp.pad(pred2, ((0, 0), (0, 0), (0, hw_pad - HW)))
        label2 = jnp.pad(label2, ((0, 0), (0, 0), (0, hw_pad - HW)))
    pred4 = pred2.reshape(N, C, grid_r * TR, L)
    label4 = label2.reshape(N, 1, grid_r * TR, L)

    # In-register chunk height (bounds vreg pressure under the unrolled
    # channel loop); always a multiple of 8 dividing TR.
    RO = 32 if TR % 32 == 0 else (16 if TR % 16 == 0 else 8)

    out_shape = jax.ShapeDtypeStruct((N, grid_r, 8, L), jnp.float32)
    out_spec = pl.BlockSpec((1, 1, 8, L), lambda n, r: (n, r, 0, 0))

    kernel = functools.partial(_dice_kernel, C=C, TR=TR, L=L, RO=RO)

    out_i, out_s = pl.pallas_call(
        kernel,
        out_shape=(out_shape, out_shape),
        grid_spec=pltpu.PrefetchScalarGridSpec(
            num_scalar_prefetch=0,
            grid=(N, grid_r),
            in_specs=[
                pl.BlockSpec((1, C, TR, L), lambda n, r: (n, 0, r, 0)),
                pl.BlockSpec((1, 1, TR, L), lambda n, r: (n, 0, r, 0)),
            ],
            out_specs=[out_spec, out_spec],
        ),
        # Per-(n, r) partial outputs -> no cross-step dependency, so both grid
        # axes are "parallel" (v7x megacore shards the pixel axis too).
        compiler_params=pltpu.CompilerParams(
            dimension_semantics=("parallel", "parallel"),
        ),
    )(pred4, label4)

    # Tiny final reduction + dice formula in the wrapper.
    i_sum = jnp.sum(out_i)
    s_sum = jnp.sum(out_s)            # = sum(m1) + sum(m2)
    return 1.0 - 2.0 * (i_sum + SMOOTH) / (s_sum + SMOOTH)


def dice_loss_ref(pred, label):
    """Pure-JAX reference mirroring the PyTorch module."""
    m1 = jnp.argmax(pred, axis=1).reshape(-1).astype(jnp.float32)
    m2 = label.reshape(-1).astype(jnp.float32)
    inter = m1 * m2
    return 1.0 - 2.0 * (jnp.sum(inter) + SMOOTH) / (jnp.sum(m1) + jnp.sum(m2) + SMOOTH)


if __name__ == "__main__":
    key = jax.random.PRNGKey(0)
    k1, k2 = jax.random.split(key)

    N, C, H, W = 2, 4, 16, 16
    pred = jax.random.normal(k1, (N, C, H, W), dtype=jnp.float32)
    label = jax.random.randint(k2, (N, H, W), 0, C, dtype=jnp.int32)

    loss = dice_loss(pred, label)
    jax.block_until_ready(loss)

    ref = dice_loss_ref(pred, label)
    np.testing.assert_allclose(np.asarray(loss), np.asarray(ref), rtol=1e-5, atol=1e-6)

    print("KERNEL_OK")
</pallas_src>

<mosaic_0001>
module attributes {stable_mosaic.version = 11 : i64} {
  func.func @_dice_kernel(%arg0: i32, %arg1: i32, %arg2: memref<1x4x8x128xf32, #tpu.memory_space<vmem>>, %arg3: memref<1x1x8x128xi32, #tpu.memory_space<vmem>>, %arg4: memref<1x1x8x128xf32, #tpu.memory_space<vmem>>, %arg5: memref<1x1x8x128xf32, #tpu.memory_space<vmem>>) attributes {dimension_semantics = [#tpu.dimension_semantics<parallel>, #tpu.dimension_semantics<parallel>], iteration_bounds = array<i64: 2, 1>, scalar_prefetch = 0 : i64, scratch_operands = 0 : i64, tpu.core_type = #tpu.core_type<tc>, window_params = [{transform_indices = @transform_0, window_bounds = array<i64: 1, 4, 8, 128>}, {transform_indices = @transform_1, window_bounds = array<i64: 1, 1, 8, 128>}, {transform_indices = @transform_2, window_bounds = array<i64: 1, 1, 8, 128>}, {transform_indices = @transform_3, window_bounds = array<i64: 1, 1, 8, 128>}]} {
    %cst = arith.constant 0.000000e+00 : f32
    %0 = vector.broadcast %cst : f32 to vector<8x128xf32>
    %cst_0 = arith.constant 0.000000e+00 : f32
    %1 = vector.broadcast %cst_0 : f32 to vector<8x128xf32>
    %c0_i32 = arith.constant 0 : i32
    %c8_i32 = arith.constant 8 : i32
    %2 = arith.muli %c0_i32, %c8_i32 : i32
    %3 = tpu.assume_multiple %2, 8 : i32
    %c0 = arith.constant 0 : index
    %c0_1 = arith.constant 0 : index
    %4 = arith.index_cast %3 : i32 to index
    %c0_2 = arith.constant 0 : index
    %5 = vector.load %arg2[%c0, %c0_1, %4, %c0_2] : memref<1x4x8x128xf32, #tpu.memory_space<vmem>>, vector<1x1x8x128xf32>
    %6 = vector.shape_cast %5 : vector<1x1x8x128xf32> to vector<8x128xf32>
    %cst_3 = arith.constant 0.000000e+00 : f32
    %7 = vector.broadcast %cst_3 : f32 to vector<8x128xf32>
    %c0_4 = arith.constant 0 : index
    %c1 = arith.constant 1 : index
    %8 = arith.index_cast %3 : i32 to index
    %c0_5 = arith.constant 0 : index
    %9 = vector.load %arg2[%c0_4, %c1, %8, %c0_5] : memref<1x4x8x128xf32, #tpu.memory_space<vmem>>, vector<1x1x8x128xf32>
    %10 = vector.shape_cast %9 : vector<1x1x8x128xf32> to vector<8x128xf32>
    %11 = arith.cmpf ogt, %10, %6 : vector<8x128xf32>
    %12 = arith.select %11, %10, %6 : vector<8x128xi1>, vector<8x128xf32>
    %cst_6 = arith.constant 1.000000e+00 : f32
    %13 = vector.broadcast %cst_6 : f32 to vector<8x128xf32>
    %14 = arith.select %11, %13, %7 : vector<8x128xi1>, vector<8x128xf32>
    %c0_7 = arith.constant 0 : index
    %c2 = arith.constant 2 : index
    %15 = arith.index_cast %3 : i32 to index
    %c0_8 = arith.constant 0 : index
    %16 = vector.load %arg2[%c0_7, %c2, %15, %c0_8] : memref<1x4x8x128xf32, #tpu.memory_space<vmem>>, vector<1x1x8x128xf32>
    %17 = vector.shape_cast %16 : vector<1x1x8x128xf32> to vector<8x128xf32>
    %18 = arith.cmpf ogt, %17, %12 : vector<8x128xf32>
    %19 = arith.select %18, %17, %12 : vector<8x128xi1>, vector<8x128xf32>
    %cst_9 = arith.constant 2.000000e+00 : f32
    %20 = vector.broadcast %cst_9 : f32 to vector<8x128xf32>
    %21 = arith.select %18, %20, %14 : vector<8x128xi1>, vector<8x128xf32>
    %c0_10 = arith.constant 0 : index
    %c3 = arith.constant 3 : index
    %22 = arith.index_cast %3 : i32 to index
    %c0_11 = arith.constant 0 : index
    %23 = vector.load %arg2[%c0_10, %c3, %22, %c0_11] : memref<1x4x8x128xf32, #tpu.memory_space<vmem>>, vector<1x1x8x128xf32>
    %24 = vector.shape_cast %23 : vector<1x1x8x128xf32> to vector<8x128xf32>
    %25 = arith.cmpf ogt, %24, %19 : vector<8x128xf32>
    %cst_12 = arith.constant 3.000000e+00 : f32
    %26 = vector.broadcast %cst_12 : f32 to vector<8x128xf32>
    %27 = arith.select %25, %26, %21 : vector<8x128xi1>, vector<8x128xf32>
    %c0_13 = arith.constant 0 : index
    %c0_14 = arith.constant 0 : index
    %28 = arith.index_cast %3 : i32 to index
    %c0_15 = arith.constant 0 : index
    %29 = vector.load %arg3[%c0_13, %c0_14, %28, %c0_15] : memref<1x1x8x128xi32, #tpu.memory_space<vmem>>, vector<1x1x8x128xi32>
    %30 = vector.shape_cast %29 : vector<1x1x8x128xi32> to vector<8x128xi32>
    %31 = arith.sitofp %30 : vector<8x128xi32> to vector<8x128xf32>
    %32 = arith.mulf %27, %31 : vector<8x128xf32>
    %33 = arith.addf %0, %32 : vector<8x128xf32>
    %34 = arith.addf %27, %31 : vector<8x128xf32>
    %35 = arith.addf %1, %34 : vector<8x128xf32>
    %c1_i32 = arith.constant 1 : i32
    %c0_16 = arith.constant 0 : index
    %c0_17 = arith.constant 0 : index
    %c0_18 = arith.constant 0 : index
    %c0_19 = arith.constant 0 : index
    %36 = vector.load %arg4[%c0_16, %c0_17, %c0_18, %c0_19] : memref<1x1x8x128xf32, #tpu.memory_space<vmem>>, vector<1x1x8x128xf32>
    %37 = vector.shape_cast %36 : vector<1x1x8x128xf32> to vector<8x128xf32>
    %38 = vector.shape_cast %33 : vector<8x128xf32> to vector<1x1x8x128xf32>
    tpu.vector_store %arg4[%c0_16, %c0_17, %c0_18, %c0_19], %38 {strides = array<i32>} : memref<1x1x8x128xf32, #tpu.memory_space<vmem>>, vector<1x1x8x128xf32>,
    %c0_20 = arith.constant 0 : index
    %c0_21 = arith.constant 0 : index
    %c0_22 = arith.constant 0 : index
    %c0_23 = arith.constant 0 : index
    %39 = vector.load %arg5[%c0_20, %c0_21, %c0_22, %c0_23] : memref<1x1x8x128xf32, #tpu.memory_space<vmem>>, vector<1x1x8x128xf32>
    %40 = vector.shape_cast %39 : vector<1x1x8x128xf32> to vector<8x128xf32>
    %41 = vector.shape_cast %35 : vector<8x128xf32> to vector<1x1x8x128xf32>
    tpu.vector_store %arg5[%c0_20, %c0_21, %c0_22, %c0_23], %41 {strides = array<i32>} : memref<1x1x8x128xf32, #tpu.memory_space<vmem>>, vector<1x1x8x128xf32>,
    return
  }
  func.func @transform_0(%arg0: i32, %arg1: i32) -> (i32, i32, i32, i32) {
    %c0_i32 = arith.constant 0 : i32
    %c0_i32_0 = arith.constant 0 : i32
    %c0_i32_1 = arith.constant 0 : i32
    return %arg0, %c0_i32, %arg1, %c0_i32_0 : i32, i32, i32, i32
  }
  func.func @transform_1(%arg0: i32, %arg1: i32) -> (i32, i32, i32, i32) {
    %c0_i32 = arith.constant 0 : i32
    %c0_i32_0 = arith.constant 0 : i32
    %c0_i32_1 = arith.constant 0 : i32
    return %arg0, %c0_i32, %arg1, %c0_i32_0 : i32, i32, i32, i32
  }
  func.func @transform_2(%arg0: i32, %arg1: i32) -> (i32, i32, i32, i32) {
    %c0_i32 = arith.constant 0 : i32
    %c0_i32_0 = arith.constant 0 : i32
    %c0_i32_1 = arith.constant 0 : i32
    return %arg0, %arg1, %c0_i32, %c0_i32_0 : i32, i32, i32, i32
  }
  func.func @transform_3(%arg0: i32, %arg1: i32) -> (i32, i32, i32, i32) {
    %c0_i32 = arith.constant 0 : i32
    %c0_i32_0 = arith.constant 0 : i32
    %c0_i32_1 = arith.constant 0 : i32
    return %arg0, %arg1, %c0_i32, %c0_i32_0 : i32, i32, i32, i32
  }
}

</mosaic_0001>

<bundles_post_ra>
// kernel: dice_loss.1
= control target key start
LH: loop header
LB: loop body
LE: loop exit
PB: predicated region body
PF: predicated region fallthrough
CT: control target
= control target key end

     0   :  { %s495_s12 = smov 0   ;;  %s497_s13 = smov 0   ;;  %s534_s0 = inlined_call_operand.vmem [shape: f32[2,4,8,128], index: 0, kind: input, shape index: {}]   ;;  %s535_s1 = inlined_call_operand.vmem [shape: s32[2,1,8,128], index: 1, kind: input, shape index: {}]   ;;  %s536_s2 = inlined_call_operand.vmem [shape: f32[2,1,8,128], index: 2, kind: output, shape index: {0}]   ;;  %s537_s3 = inlined_call_operand.vmem [shape: f32[2,1,8,128], index: 3, kind: output, shape index: {1}]  }
   0x1   :  { %s499_s14 = smov 0  }
   0x2 LB: > { %s26_s15 = sadd.s32 1, %s468_s13  ;;  %p413_p0 = scmp.ge.s32.totalorder %s472_s14, 1  ;;  %s472_s14 = sphi %s499_s14, %s14_s14   ;;  %s468_s13 = sphi %s497_s13, %s539_s13   ;;  %s464_s12 = sphi %s495_s12, %s538_s12  }
   0x3   : > { %p28_p1 = scmp.ge.s32.totalorder %s26_s15, 2  ;;  %p175_p2 = scmp.lt.s32.totalorder %s472_s14, 3 }
   0x5   : > { %s541_s15 = smov (%p28_p1, %s26_s15), 0  ;;  %p176_p3 = pnand %p413_p0, %p175_p2 }
   0x6   : > { %p218_p4 = scmp.lt.s32.totalorder (!%p176_p3), %s464_s12, 1 }
   0x7   : > { %179 = sbr.rel (%p176_p3) target bundleno = 25 (0x19), region = 28 }
   0xc   : > { %s543_s12 = smov (!%p218_p4, %s464_s12), 1  ;;  %v474_v5 = vmov 0.0  }
   0xd   : > { %s424_s16 = sshll.u32 %s543_s12, 5  ;;  %s416_s17 = sshll.u32 %s543_s12, 3 }
   0xe   : > { %s225_s20 = scalar_lea.vmem %s534_s0, %s424_s16  ;;  %s232_s23 = scalar_lea.vmem %s535_s1, %s416_s17 }
   0xf   : > { %v247_v0 = vld [vmem:[%s225_s20] sm:$0xff]  ;;  %v419_v1 = vld [vmem:[%s225_s20 + $0x8] sm:$0xff]  ;;  %v420_v2 = vld [vmem:[%s225_s20 + $0x10] sm:$0xff]  ;;  %s239_s26 = scalar_lea.vmem %s536_s2, %s416_s17  ;;  %s246_s29 = scalar_lea.vmem %s537_s3, %s416_s17 }
  0x10   : > { %vm251_vm0 = vcmp.gt.f32.partialorder %v419_v1, %v247_v0  ;;  %v265_v3 = vld [vmem:[%s232_s23] sm:$0xff]  ;;  %v421_v7 = vld [vmem:[%s225_s20 + $0x18] sm:$0xff] }
  0x11   : > { %v252_v4 = vsel %vm251_vm0, %v419_v1, %v247_v0  ;;  %v253_v6 = vsel %vm251_vm0, 1.0, %v474_v5  ;;  %v266_v8 = vcvt.s32.f32 %v265_v3 }
  0x12   : > { %vm257_vm1 = vcmp.gt.f32.partialorder %v420_v2, %v252_v4 }
  0x13   : > { %v258_v9 = vsel %vm257_vm1, %v420_v2, %v252_v4  ;;  %v259_v10 = vsel %vm257_vm1, 2.0, %v253_v6 }
  0x14   : > { %vm263_vm2 = vcmp.gt.f32.partialorder %v421_v7, %v258_v9 }
  0x15   : > { %v264_v11 = vsel %vm263_vm2, 3.0, %v259_v10 }
  0x16   : > { %v267_v12 = vmul.f32 %v266_v8, %v264_v11  ;;  %v269_v13 = vadd.f32 %v266_v8, %v264_v11 }
  0x18   : > { %271 = vst [vmem:[%s239_s26] sm:$0xff] %v267_v12  ;;  %272 = vst [vmem:[%s246_s29] sm:$0xff] %v269_v13 }
  0x19 PF: > { %s14_s14 = sadd.s32 1, %s472_s14   ;;  %s538_s12 = smov %s468_s13 }
  0x1a   : > { %p11_p5 = scmp.ge.s32.totalorder %s14_s14, 4   ;;  %s539_s13 = smov %s541_s15 }
  0x1c   :  { %13 = sbr.rel (!%p11_p5) target bundleno = 2 (0x2), region = 76 }

</bundles_post_ra>
